<compile_context>
chip_gen: v6e
topology: v6e:2x2x1
jax: 0.10.0
libtpu: 0.0.40
codegen_flags: <defaults>
</compile_context>

<pallas_src>
import functools

import numpy as np
import jax
import jax.numpy as jnp
from jax.experimental import pallas as pl
from jax.experimental.pallas import tpu as pltpu


def _cdiv(a: int, b: int) -> int:
    return -(-a // b)


def _round_up(x: int, m: int) -> int:
    return _cdiv(x, m) * m


def _tpu_caps():
    """Best-effort chip detection -> (feature pad granularity, physical VMEM, #TCs)."""
    kind = ""
    try:
        dev = jax.devices()[0]
        if dev.platform == "tpu":
            kind = str(dev.device_kind).lower()
    except Exception:
        pass
    old_gen = any(tag in kind for tag in ("v2", "v3", "v4", "v5"))
    # v6e / v7x MXUs are 2x256x256 -> pad K/N of large matmuls to 256; v5e is 128x128.
    lane_gran = 128 if old_gen else 256
    if old_gen or "v6" in kind:
        vmem_phys = 128 << 20
        num_tc = 1
    else:                       # v7x (or unknown: conservative)
        vmem_phys = 64 << 20
        num_tc = 2
    return lane_gran, vmem_phys, num_tc


def _feature_pad(d: int, gran: int) -> int:
    d = max(d, 1)
    if d <= 128:
        return _round_up(d, 128)
    return _round_up(d, gran)


# ----------------------------------------------------------------------------
# Kernels
# ----------------------------------------------------------------------------
def _fcnet_resident_kernel(*refs, n_hidden, use_bias):
    """All layers fused, all weights resident in VMEM.

    refs = (x, [w_hidden(Lh,Dp,Dp)], w_last(Dp,Dop),
            [b_hidden(Lh,1,Dp), b_last(1,Dop)], out)
    """
    x_ref = refs[0]
    o_ref = refs[-1]
    idx = 1
    wh_ref = None
    if n_hidden > 0:
        wh_ref = refs[idx]; idx += 1
    wl_ref = refs[idx]; idx += 1
    bh_ref = bl_ref = None
    if use_bias:
        if n_hidden > 0:
            bh_ref = refs[idx]; idx += 1
        bl_ref = refs[idx]; idx += 1

    h = x_ref[...]                                           # bf16 [tm, Dp]
    if use_bias and n_hidden > 0:
        bh_all = bh_ref[...]                                 # f32 [Lh, 1, Dp]
    for layer in range(n_hidden):
        y = jnp.dot(h, wh_ref[layer], preferred_element_type=jnp.float32)
        if use_bias:
            y = y + bh_all[layer]                            # (1, Dp) broadcast
        h = jnp.maximum(y, 0.0).astype(jnp.bfloat16)         # ReLU (f32 VPU) -> bf16
    y = jnp.dot(h, wl_ref[...], preferred_element_type=jnp.float32)
    if use_bias:
        y = y + bl_ref[...]                                  # (1, Dop) broadcast
    o_ref[...] = y.astype(o_ref.dtype)                       # lane-dense store


def _fcnet_stream_kernel(*refs, use_bias):
    """Layer-streamed variant: grid = (batch_blocks, n_hidden).

    refs = (x, w_hidden_block(1,Dp,Dp), w_last(Dp,Dop),
            [b_hidden_block(1,1,Dp), b_last(1,Dop)], out, act_scratch)
    The activation lives in VMEM scratch across the layer axis; hidden-layer
    weights are streamed one layer per grid step (double-buffered by Pallas).
    """
    x_ref = refs[0]
    wh_ref = refs[1]
    wl_ref = refs[2]
    idx = 3
    bh_ref = bl_ref = None
    if use_bias:
        bh_ref = refs[3]
        bl_ref = refs[4]
        idx = 5
    o_ref = refs[idx]
    act_ref = refs[idx + 1]

    k = pl.program_id(1)
    nk = pl.num_programs(1)

    @pl.when(k == 0)
    def _():
        act_ref[...] = x_ref[...]

    # Hidden layer k.
    y = jnp.dot(act_ref[...], wh_ref[0], preferred_element_type=jnp.float32)
    if use_bias:
        y = y + bh_ref[0]                                    # (1, Dp) broadcast
    h = jnp.maximum(y, 0.0).astype(jnp.bfloat16)

    @pl.when(k < nk - 1)
    def _():
        act_ref[...] = h                                     # carry to next layer step

    @pl.when(k == nk - 1)
    def _():
        z = jnp.dot(h, wl_ref[...], preferred_element_type=jnp.float32)
        if use_bias:
            z = z + bl_ref[...]
        o_ref[...] = z.astype(o_ref.dtype)


# ----------------------------------------------------------------------------
# Wrapper
# ----------------------------------------------------------------------------
class FCNetPallas:
    """Mirrors torch FCNet: (n_layers-1) x [Linear(D,D), ReLU], then Linear(D,out)."""

    def __init__(self, input_dim: int, out_dim: int, n_layers: int,
                 activation: bool = True, bias: bool = True, key=None,
                 out_dtype=jnp.bfloat16, force_stream: bool = False):
        assert n_layers >= 1
        self.n_layers = n_layers
        self.n_hidden = n_layers - 1
        self.input_dim = input_dim
        self.out_dim = out_dim
        self.bias = bias
        self.activation = activation          # accepted for parity; ReLU always applied
        self.out_dtype = out_dtype
        self.out_itemsize = int(np.dtype(out_dtype).itemsize)
        self.force_stream = force_stream
        self._single_buffer_ok = None

        self.lane_gran, self.vmem_phys, self.num_tc = _tpu_caps()
        self.dp_in = _feature_pad(input_dim, self.lane_gran)
        self.dp_out = _feature_pad(out_dim, self.lane_gran)

        if key is None:
            key = jax.random.PRNGKey(0)

        dims = [(input_dim, input_dim)] * self.n_hidden + [(input_dim, out_dim)]
        self.raw_params = []                  # unpadded f32 (w_t [din,dout], b [1,dout])
        w_h, b_h = [], []
        self.w_last = None
        self.b_last = None
        for li, (din, dout) in enumerate(dims):
            key, kw, kb = jax.random.split(key, 3)
            bound = 1.0 / float(din) ** 0.5    # torch.nn.Linear-style init
            w = jax.random.uniform(kw, (dout, din), jnp.float32, -bound, bound)
            b = jax.random.uniform(kb, (1, dout), jnp.float32, -bound, bound)
            if not bias:
                b = jnp.zeros((1, dout), jnp.float32)
            w_t = jnp.transpose(w)             # [din, dout]
            self.raw_params.append((w_t, b))

            dout_p = self.dp_in if li < self.n_hidden else self.dp_out
            w_pad = jnp.zeros((self.dp_in, dout_p), jnp.float32).at[:din, :dout].set(w_t)
            b_pad = jnp.zeros((1, dout_p), jnp.float32).at[:, :dout].set(b)
            if li < self.n_hidden:
                w_h.append(w_pad.astype(jnp.bfloat16))
                b_h.append(b_pad)
            else:
                self.w_last = w_pad.astype(jnp.bfloat16)       # [Dp, Dop]
                self.b_last = b_pad                            # [1, Dop]
        if self.n_hidden > 0:
            self.w_hidden = jnp.stack(w_h)                     # [Lh, Dp, Dp] bf16
            self.b_hidden = jnp.stack(b_h)                     # [Lh, 1, Dp]  f32
        else:
            self.w_hidden = None
            self.b_hidden = None

    # ---- helpers ------------------------------------------------------------
    def _io_block_bytes(self, tm: int) -> int:
        return (2 * tm * self.dp_in * 2                       # x block (bf16, 2-buf)
                + 2 * tm * self.dp_out * self.out_itemsize    # out block (2-buf)
                + 2 * tm * max(self.dp_in, self.dp_out) * 4)  # f32 intermediates

    # ---- forward ------------------------------------------------------------
    def __call__(self, x):
        B, D = x.shape
        assert D == self.input_dim
        dp_in, dp_out = self.dp_in, self.dp_out

        # Batch tiling: target ~512 rows/block, balance block sizes to limit pad
        # waste, and guarantee >=2 blocks on multi-TC chips so megacore has work.
        bp8 = max(8, _round_up(B, 8))
        nblk = _cdiv(bp8, min(512, bp8))
        if bp8 > 8 and self.num_tc > 1:
            nblk = max(nblk, self.num_tc)
        tm = _round_up(_cdiv(bp8, nblk), 8)
        while tm > 8 and self._io_block_bytes(tm) > self.vmem_phys // 2:
            nblk += nblk
            tm = _round_up(_cdiv(bp8, nblk), 8)
        bp = tm * nblk

        # Input: skip the materialized pad when already aligned.
        if B == bp and D == dp_in:
            x_in = x if x.dtype == jnp.bfloat16 else x.astype(jnp.bfloat16)
        else:
            x_in = jnp.zeros((bp, dp_in), jnp.bfloat16).at[:B, :D].set(
                x.astype(jnp.bfloat16))

        # VMEM footprint -> resident vs layer-streaming path, and vmem limit.
        w_bytes = int(self.w_last.size) * 2
        b_bytes = int(self.b_last.size) * 4 if self.bias else 0
        if self.n_hidden > 0:
            w_bytes += int(self.w_hidden.size) * 2
            if self.bias:
                b_bytes += int(self.b_hidden.size) * 4
        io_bytes = self._io_block_bytes(tm)
        resident_need = w_bytes + b_bytes + io_bytes
        budget = self.vmem_phys - (8 << 20)
        use_stream = self.force_stream or (
            self.n_hidden > 0 and resident_need > int(0.8 * budget))

        if use_stream:
            need = (2 * dp_in * dp_in * 2                      # streamed layer slab (2-buf)
                    + int(self.w_last.size) * 2 + b_bytes
                    + io_bytes + tm * dp_in * 2)               # activation scratch
        else:
            need = resident_need
        vmem_limit = int(min(self.vmem_phys - (4 << 20),
                             max(need + (16 << 20), 32 << 20)))

        nblocks = bp // tm
        flops = 2 * bp * (self.n_hidden * dp_in * dp_in + dp_in * dp_out)
        bytes_accessed = (bp * dp_in * 2 + bp * dp_out * self.out_itemsize
                          + b_bytes + w_bytes * (nblocks if use_stream else 1))
        cost = pl.CostEstimate(flops=int(flops), transcendentals=0,
                               bytes_accessed=int(bytes_accessed))

        runner = self._run_stream if use_stream else self._run_resident
        if self._single_buffer_ok is None:
            try:
                out_pad = runner(x_in, tm, bp, vmem_limit, cost, True)
                jax.block_until_ready(out_pad)
                self._single_buffer_ok = True
            except Exception:
                self._single_buffer_ok = False
                out_pad = runner(x_in, tm, bp, vmem_limit, cost, False)
        else:
            out_pad = runner(x_in, tm, bp, vmem_limit, cost, self._single_buffer_ok)

        return out_pad[:B, :self.out_dim]

    # ---- resident path ------------------------------------------------------
    def _run_resident(self, x_in, tm, bp, vmem_limit, cost, single_buffer):
        dp_in, dp_out = self.dp_in, self.dp_out
        Lh = self.n_hidden

        def const_spec(shape):
            imap = lambda i: (0,) * len(shape)
            if single_buffer:
                return pl.BlockSpec(shape, imap, pipeline_mode=pl.Buffered(1))
            return pl.BlockSpec(shape, imap)

        inputs = [x_in]
        in_specs = [pl.BlockSpec((tm, dp_in), lambda i: (i, 0))]
        if Lh > 0:
            inputs.append(self.w_hidden)
            in_specs.append(const_spec(tuple(self.w_hidden.shape)))
        inputs.append(self.w_last)
        in_specs.append(const_spec(tuple(self.w_last.shape)))
        if self.bias:
            if Lh > 0:
                inputs.append(self.b_hidden)
                in_specs.append(const_spec(tuple(self.b_hidden.shape)))
            inputs.append(self.b_last)
            in_specs.append(const_spec(tuple(self.b_last.shape)))

        kernel = functools.partial(_fcnet_resident_kernel,
                                   n_hidden=Lh, use_bias=self.bias)
        return pl.pallas_call(
            kernel,
            out_shape=jax.ShapeDtypeStruct((bp, dp_out), self.out_dtype),
            grid=(bp // tm,),
            in_specs=in_specs,
            out_specs=pl.BlockSpec((tm, dp_out), lambda i: (i, 0)),
            compiler_params=pltpu.CompilerParams(
                dimension_semantics=("parallel",),
                vmem_limit_bytes=vmem_limit),
            cost_estimate=cost,
        )(*inputs)

    # ---- layer-streaming path (big models / v7x 64 MiB VMEM) -----------------
    def _run_stream(self, x_in, tm, bp, vmem_limit, cost, single_buffer):
        dp_in, dp_out = self.dp_in, self.dp_out
        Lh = self.n_hidden
        assert Lh > 0

        def const_spec(shape):
            imap = lambda i, k: (0,) * len(shape)
            if single_buffer:
                return pl.BlockSpec(shape, imap, pipeline_mode=pl.Buffered(1))
            return pl.BlockSpec(shape, imap)

        inputs = [x_in, self.w_hidden, self.w_last]
        in_specs = [
            pl.BlockSpec((tm, dp_in), lambda i, k: (i, 0)),            # batch tile
            pl.BlockSpec((1, dp_in, dp_in), lambda i, k: (k, 0, 0)),   # streamed layer
            const_spec(tuple(self.w_last.shape)),                      # resident last W
        ]
        if self.bias:
            inputs += [self.b_hidden, self.b_last]
            in_specs += [
                pl.BlockSpec((1, 1, dp_in), lambda i, k: (k, 0, 0)),   # streamed bias
                const_spec(tuple(self.b_last.shape)),                  # resident last b
            ]

        kernel = functools.partial(_fcnet_stream_kernel, use_bias=self.bias)
        return pl.pallas_call(
            kernel,
            out_shape=jax.ShapeDtypeStruct((bp, dp_out), self.out_dtype),
            grid=(bp // tm, Lh),
            in_specs=in_specs,
            out_specs=pl.BlockSpec((tm, dp_out), lambda i, k: (i, 0)),
            scratch_shapes=[pltpu.VMEM((tm, dp_in), jnp.bfloat16)],    # activation carry
            compiler_params=pltpu.CompilerParams(
                dimension_semantics=("parallel", "arbitrary"),
                vmem_limit_bytes=vmem_limit),
            cost_estimate=cost,
        )(*inputs)


def _reference_forward(model, x):
    """Pure-JAX reference applying the SAME bf16-feed / f32-accumulate math."""
    h = x.astype(jnp.bfloat16)
    L = len(model.raw_params)
    for i, (w_t, b) in enumerate(model.raw_params):
        y = jnp.dot(h, w_t.astype(jnp.bfloat16), preferred_element_type=jnp.float32)
        if model.bias:
            y = y + b
        if i != L - 1:
            h = jnp.maximum(y, 0.0).astype(jnp.bfloat16)
        else:
            h = y
    return h  # f32


if __name__ == "__main__":
    # Small shapes consistent with the module's forward: x is [batch, input_dim].
    batch, input_dim, out_dim, n_layers = 8, 32, 16, 3

    key = jax.random.PRNGKey(0)
    kx, kp = jax.random.split(key)
    x = jax.random.normal(kx, (batch, input_dim), jnp.float32)

    model = FCNetPallas(input_dim, out_dim, n_layers, activation=True,
                        bias=True, key=kp)

    out = jax.block_until_ready(model(x))
    assert out.shape == (batch, out_dim)

    ref = _reference_forward(model, x)
    ref_q = ref.astype(model.out_dtype).astype(jnp.float32)
    assert jnp.allclose(out.astype(jnp.float32), ref_q, atol=5e-2, rtol=5e-2), float(
        jnp.max(jnp.abs(out.astype(jnp.float32) - ref_q)))

    # Also exercise the layer-streaming path (what large models use on v7x).
    model.force_stream = True
    out_s = jax.block_until_ready(model(x))
    assert out_s.shape == (batch, out_dim)
    assert jnp.allclose(out_s.astype(jnp.float32), ref_q, atol=5e-2, rtol=5e-2), float(
        jnp.max(jnp.abs(out_s.astype(jnp.float32) - ref_q)))

    print("KERNEL_OK")
</pallas_src>

<mosaic_0001>
module attributes {stable_mosaic.version = 11 : i64} {
  func.func @_fcnet_resident_kernel(%arg0: i32, %arg1: memref<8x128xbf16, #tpu.memory_space<vmem>>, %arg2: memref<2x128x128xbf16, #tpu.memory_space<vmem>>, %arg3: memref<128x128xbf16, #tpu.memory_space<vmem>>, %arg4: memref<2x1x128xf32, #tpu.memory_space<vmem>>, %arg5: memref<1x128xf32, #tpu.memory_space<vmem>>, %arg6: memref<8x128xbf16, #tpu.memory_space<vmem>>) attributes {dimension_semantics = [#tpu.dimension_semantics<parallel>], iteration_bounds = array<i64: 1>, scalar_prefetch = 0 : i64, scratch_operands = 0 : i64, tpu.core_type = #tpu.core_type<tc>, window_params = [{transform_indices = @transform_0, window_bounds = array<i64: 8, 128>}, {pipeline_mode = #tpu.pipeline_mode<synchronous>, transform_indices = @transform_1, window_bounds = array<i64: 2, 128, 128>}, {pipeline_mode = #tpu.pipeline_mode<synchronous>, transform_indices = @transform_2, window_bounds = array<i64: 128, 128>}, {pipeline_mode = #tpu.pipeline_mode<synchronous>, transform_indices = @transform_3, window_bounds = array<i64: 2, 1, 128>}, {pipeline_mode = #tpu.pipeline_mode<synchronous>, transform_indices = @transform_4, window_bounds = array<i64: 1, 128>}, {transform_indices = @transform_5, window_bounds = array<i64: 8, 128>}]} {
    %c0 = arith.constant 0 : index
    %c0_0 = arith.constant 0 : index
    %0 = vector.load %arg1[%c0, %c0_0] : memref<8x128xbf16, #tpu.memory_space<vmem>>, vector<8x128xbf16>
    %c0_1 = arith.constant 0 : index
    %c0_2 = arith.constant 0 : index
    %c0_3 = arith.constant 0 : index
    %1 = vector.load %arg4[%c0_1, %c0_2, %c0_3] : memref<2x1x128xf32, #tpu.memory_space<vmem>>, vector<2x1x128xf32>
    %c0_4 = arith.constant 0 : index
    %c0_5 = arith.constant 0 : index
    %c0_6 = arith.constant 0 : index
    %2 = vector.load %arg2[%c0_4, %c0_5, %c0_6] : memref<2x128x128xbf16, #tpu.memory_space<vmem>>, vector<1x128x128xbf16>
    %3 = vector.shape_cast %2 : vector<1x128x128xbf16> to vector<128x128xbf16>
    %cst = arith.constant dense<0.000000e+00> : vector<8x128xf32>
    %4 = tpu.matmul %0, %3, %cst {dimension_numbers = #tpu.dot_dimension_numbers<[1], [0], [0], [1], [0, 0, 1, 1], [], []>} : vector<8x128xbf16>, vector<128x128xbf16>, vector<8x128xf32> -> vector<8x128xf32>
    %5 = vector.extract_strided_slice %1 {offsets = [0, 0, 0], sizes = [1, 1, 128], strides = [1, 1, 1]} : vector<2x1x128xf32> to vector<1x1x128xf32>
    %6 = vector.shape_cast %5 : vector<1x1x128xf32> to vector<1x128xf32>
    %7 = vector.broadcast %6 : vector<1x128xf32> to vector<8x128xf32>
    %8 = arith.addf %4, %7 : vector<8x128xf32>
    %cst_7 = arith.constant 0.000000e+00 : f32
    %9 = vector.broadcast %cst_7 : f32 to vector<8x128xf32>
    %10 = arith.maximumf %8, %9 : vector<8x128xf32>
    %11 = arith.truncf %10 : vector<8x128xf32> to vector<8x128xbf16>
    %c1 = arith.constant 1 : index
    %c0_8 = arith.constant 0 : index
    %c0_9 = arith.constant 0 : index
    %12 = vector.load %arg2[%c1, %c0_8, %c0_9] : memref<2x128x128xbf16, #tpu.memory_space<vmem>>, vector<1x128x128xbf16>
    %13 = vector.shape_cast %12 : vector<1x128x128xbf16> to vector<128x128xbf16>
    %cst_10 = arith.constant dense<0.000000e+00> : vector<8x128xf32>
    %14 = tpu.matmul %11, %13, %cst_10 {dimension_numbers = #tpu.dot_dimension_numbers<[1], [0], [0], [1], [0, 0, 1, 1], [], []>} : vector<8x128xbf16>, vector<128x128xbf16>, vector<8x128xf32> -> vector<8x128xf32>
    %15 = vector.extract_strided_slice %1 {offsets = [1, 0, 0], sizes = [1, 1, 128], strides = [1, 1, 1]} : vector<2x1x128xf32> to vector<1x1x128xf32>
    %16 = vector.shape_cast %15 : vector<1x1x128xf32> to vector<1x128xf32>
    %17 = vector.broadcast %16 : vector<1x128xf32> to vector<8x128xf32>
    %18 = arith.addf %14, %17 : vector<8x128xf32>
    %cst_11 = arith.constant 0.000000e+00 : f32
    %19 = vector.broadcast %cst_11 : f32 to vector<8x128xf32>
    %20 = arith.maximumf %18, %19 : vector<8x128xf32>
    %21 = arith.truncf %20 : vector<8x128xf32> to vector<8x128xbf16>
    %c0_12 = arith.constant 0 : index
    %c0_13 = arith.constant 0 : index
    %22 = vector.load %arg3[%c0_12, %c0_13] : memref<128x128xbf16, #tpu.memory_space<vmem>>, vector<128x128xbf16>
    %cst_14 = arith.constant dense<0.000000e+00> : vector<8x128xf32>
    %23 = tpu.matmul %21, %22, %cst_14 {dimension_numbers = #tpu.dot_dimension_numbers<[1], [0], [0], [1], [0, 0, 1, 1], [], []>} : vector<8x128xbf16>, vector<128x128xbf16>, vector<8x128xf32> -> vector<8x128xf32>
    %c0_15 = arith.constant 0 : index
    %c0_16 = arith.constant 0 : index
    %24 = vector.load %arg5[%c0_15, %c0_16] : memref<1x128xf32, #tpu.memory_space<vmem>>, vector<1x128xf32>
    %25 = vector.broadcast %24 : vector<1x128xf32> to vector<8x128xf32>
    %26 = arith.addf %23, %25 : vector<8x128xf32>
    %27 = arith.truncf %26 : vector<8x128xf32> to vector<8x128xbf16>
    %c0_17 = arith.constant 0 : index
    %c0_18 = arith.constant 0 : index
    %28 = vector.load %arg6[%c0_17, %c0_18] : memref<8x128xbf16, #tpu.memory_space<vmem>>, vector<8x128xbf16>
    tpu.vector_store %arg6[%c0_17, %c0_18], %27 {strides = array<i32>} : memref<8x128xbf16, #tpu.memory_space<vmem>>, vector<8x128xbf16>,
    return
  }
  func.func @transform_0(%arg0: i32) -> (i32, i32) {
    %c0_i32 = arith.constant 0 : i32
    %c0_i32_0 = arith.constant 0 : i32
    return %arg0, %c0_i32 : i32, i32
  }
  func.func @transform_1(%arg0: i32) -> (i32, i32, i32) {
    %c0_i32 = arith.constant 0 : i32
    %c0_i32_0 = arith.constant 0 : i32
    %c0_i32_1 = arith.constant 0 : i32
    %c0_i32_2 = arith.constant 0 : i32
    return %c0_i32, %c0_i32_0, %c0_i32_1 : i32, i32, i32
  }
  func.func @transform_2(%arg0: i32) -> (i32, i32) {
    %c0_i32 = arith.constant 0 : i32
    %c0_i32_0 = arith.constant 0 : i32
    %c0_i32_1 = arith.constant 0 : i32
    return %c0_i32, %c0_i32_0 : i32, i32
  }
  func.func @transform_3(%arg0: i32) -> (i32, i32, i32) {
    %c0_i32 = arith.constant 0 : i32
    %c0_i32_0 = arith.constant 0 : i32
    %c0_i32_1 = arith.constant 0 : i32
    %c0_i32_2 = arith.constant 0 : i32
    return %c0_i32, %c0_i32_0, %c0_i32_1 : i32, i32, i32
  }
  func.func @transform_4(%arg0: i32) -> (i32, i32) {
    %c0_i32 = arith.constant 0 : i32
    %c0_i32_0 = arith.constant 0 : i32
    %c0_i32_1 = arith.constant 0 : i32
    return %c0_i32, %c0_i32_0 : i32, i32
  }
  func.func @transform_5(%arg0: i32) -> (i32, i32) {
    %c0_i32 = arith.constant 0 : i32
    %c0_i32_0 = arith.constant 0 : i32
    return %arg0, %c0_i32 : i32, i32
  }
}

module attributes {stable_mosaic.version = 11 : i64} {
  func.func @_fcnet_resident_kernel(%arg0: i32, %arg1: memref<8x128xbf16, #tpu.memory_space<vmem>>, %arg2: memref<2x128x128xbf16, #tpu.memory_space<vmem>>, %arg3: memref<128x128xbf16, #tpu.memory_space<vmem>>, %arg4: memref<2x1x128xf32, #tpu.memory_space<vmem>>, %arg5: memref<1x128xf32, #tpu.memory_space<vmem>>, %arg6: memref<8x128xbf16, #tpu.memory_space<vmem>>) attributes {dimension_semantics = [#tpu.dimension_semantics<parallel>], iteration_bounds = array<i64: 1>, scalar_prefetch = 0 : i64, scratch_operands = 0 : i64, tpu.core_type = #tpu.core_type<tc>, window_params = [{transform_indices = @transform_0, window_bounds = array<i64: 8, 128>}, {pipeline_mode = #tpu.pipeline_mode<synchronous>, transform_indices = @transform_1, window_bounds = array<i64: 2, 128, 128>}, {pipeline_mode = #tpu.pipeline_mode<synchronous>, transform_indices = @transform_2, window_bounds = array<i64: 128, 128>}, {pipeline_mode = #tpu.pipeline_mode<synchronous>, transform_indices = @transform_3, window_bounds = array<i64: 2, 1, 128>}, {pipeline_mode = #tpu.pipeline_mode<synchronous>, transform_indices = @transform_4, window_bounds = array<i64: 1, 128>}, {transform_indices = @transform_5, window_bounds = array<i64: 8, 128>}]} {
    %c0 = arith.constant 0 : index
    %c0_0 = arith.constant 0 : index
    %0 = vector.load %arg1[%c0, %c0_0] : memref<8x128xbf16, #tpu.memory_space<vmem>>, vector<8x128xbf16>
    %c0_1 = arith.constant 0 : index
    %c0_2 = arith.constant 0 : index
    %c0_3 = arith.constant 0 : index
    %1 = vector.load %arg4[%c0_1, %c0_2, %c0_3] : memref<2x1x128xf32, #tpu.memory_space<vmem>>, vector<2x1x128xf32>
    %c0_4 = arith.constant 0 : index
    %c0_5 = arith.constant 0 : index
    %c0_6 = arith.constant 0 : index
    %2 = vector.load %arg2[%c0_4, %c0_5, %c0_6] : memref<2x128x128xbf16, #tpu.memory_space<vmem>>, vector<1x128x128xbf16>
    %3 = vector.shape_cast %2 : vector<1x128x128xbf16> to vector<128x128xbf16>
    %cst = arith.constant dense<0.000000e+00> : vector<8x128xf32>
    %4 = tpu.matmul %0, %3, %cst {dimension_numbers = #tpu.dot_dimension_numbers<[1], [0], [0], [1], [0, 0, 1, 1], [], []>} : vector<8x128xbf16>, vector<128x128xbf16>, vector<8x128xf32> -> vector<8x128xf32>
    %5 = vector.extract_strided_slice %1 {offsets = [0, 0, 0], sizes = [1, 1, 128], strides = [1, 1, 1]} : vector<2x1x128xf32> to vector<1x1x128xf32>
    %6 = vector.shape_cast %5 : vector<1x1x128xf32> to vector<1x128xf32>
    %7 = vector.broadcast %6 : vector<1x128xf32> to vector<8x128xf32>
    %8 = arith.addf %4, %7 : vector<8x128xf32>
    %cst_7 = arith.constant 0.000000e+00 : f32
    %9 = vector.broadcast %cst_7 : f32 to vector<8x128xf32>
    %10 = arith.maximumf %8, %9 : vector<8x128xf32>
    %11 = arith.truncf %10 : vector<8x128xf32> to vector<8x128xbf16>
    %c1 = arith.constant 1 : index
    %c0_8 = arith.constant 0 : index
    %c0_9 = arith.constant 0 : index
    %12 = vector.load %arg2[%c1, %c0_8, %c0_9] : memref<2x128x128xbf16, #tpu.memory_space<vmem>>, vector<1x128x128xbf16>
    %13 = vector.shape_cast %12 : vector<1x128x128xbf16> to vector<128x128xbf16>
    %cst_10 = arith.constant dense<0.000000e+00> : vector<8x128xf32>
    %14 = tpu.matmul %11, %13, %cst_10 {dimension_numbers = #tpu.dot_dimension_numbers<[1], [0], [0], [1], [0, 0, 1, 1], [], []>} : vector<8x128xbf16>, vector<128x128xbf16>, vector<8x128xf32> -> vector<8x128xf32>
    %15 = vector.extract_strided_slice %1 {offsets = [1, 0, 0], sizes = [1, 1, 128], strides = [1, 1, 1]} : vector<2x1x128xf32> to vector<1x1x128xf32>
    %16 = vector.shape_cast %15 : vector<1x1x128xf32> to vector<1x128xf32>
    %17 = vector.broadcast %16 : vector<1x128xf32> to vector<8x128xf32>
    %18 = arith.addf %14, %17 : vector<8x128xf32>
    %cst_11 = arith.constant 0.000000e+00 : f32
    %19 = vector.broadcast %cst_11 : f32 to vector<8x128xf32>
    %20 = arith.maximumf %18, %19 : vector<8x128xf32>
    %21 = arith.truncf %20 : vector<8x128xf32> to vector<8x128xbf16>
    %c0_12 = arith.constant 0 : index
    %c0_13 = arith.constant 0 : index
    %22 = vector.load %arg3[%c0_12, %c0_13] : memref<128x128xbf16, #tpu.memory_space<vmem>>, vector<128x128xbf16>
    %cst_14 = arith.constant dense<0.000000e+00> : vector<8x128xf32>
    %23 = tpu.matmul %21, %22, %cst_14 {dimension_numbers = #tpu.dot_dimension_numbers<[1], [0], [0], [1], [0, 0, 1, 1], [], []>} : vector<8x128xbf16>, vector<128x128xbf16>, vector<8x128xf32> -> vector<8x128xf32>
    %c0_15 = arith.constant 0 : index
    %c0_16 = arith.constant 0 : index
    %24 = vector.load %arg5[%c0_15, %c0_16] : memref<1x128xf32, #tpu.memory_space<vmem>>, vector<1x128xf32>
    %25 = vector.broadcast %24 : vector<1x128xf32> to vector<8x128xf32>
    %26 = arith.addf %23, %25 : vector<8x128xf32>
    %27 = arith.truncf %26 : vector<8x128xf32> to vector<8x128xbf16>
    %c0_17 = arith.constant 0 : index
    %c0_18 = arith.constant 0 : index
    %28 = vector.load %arg6[%c0_17, %c0_18] : memref<8x128xbf16, #tpu.memory_space<vmem>>, vector<8x128xbf16>
    tpu.vector_store %arg6[%c0_17, %c0_18], %27 {strides = array<i32>} : memref<8x128xbf16, #tpu.memory_space<vmem>>, vector<8x128xbf16>,
    return
  }
  func.func @transform_0(%arg0: i32) -> (i32, i32) {
    %c0_i32 = arith.constant 0 : i32
    %c0_i32_0 = arith.constant 0 : i32
    return %arg0, %c0_i32 : i32, i32
  }
  func.func @transform_1(%arg0: i32) -> (i32, i32, i32) {
    %c0_i32 = arith.constant 0 : i32
    %c0_i32_0 = arith.constant 0 : i32
    %c0_i32_1 = arith.constant 0 : i32
    %c0_i32_2 = arith.constant 0 : i32
    return %c0_i32, %c0_i32_0, %c0_i32_1 : i32, i32, i32
  }
  func.func @transform_2(%arg0: i32) -> (i32, i32) {
    %c0_i32 = arith.constant 0 : i32
    %c0_i32_0 = arith.constant 0 : i32
    %c0_i32_1 = arith.constant 0 : i32
    return %c0_i32, %c0_i32_0 : i32, i32
  }
  func.func @transform_3(%arg0: i32) -> (i32, i32, i32) {
    %c0_i32 = arith.constant 0 : i32
    %c0_i32_0 = arith.constant 0 : i32
    %c0_i32_1 = arith.constant 0 : i32
    %c0_i32_2 = arith.constant 0 : i32
    return %c0_i32, %c0_i32_0, %c0_i32_1 : i32, i32, i32
  }
  func.func @transform_4(%arg0: i32) -> (i32, i32) {
    %c0_i32 = arith.constant 0 : i32
    %c0_i32_0 = arith.constant 0 : i32
    %c0_i32_1 = arith.constant 0 : i32
    return %c0_i32, %c0_i32_0 : i32, i32
  }
  func.func @transform_5(%arg0: i32) -> (i32, i32) {
    %c0_i32 = arith.constant 0 : i32
    %c0_i32_0 = arith.constant 0 : i32
    return %arg0, %c0_i32 : i32, i32
  }
}

</mosaic_0001>

<bundles_post_ra>
// kernel: tpu_custom_call.1
= control target key start
LH: loop header
LB: loop body
LE: loop exit
PB: predicated region body
PF: predicated region fallthrough
CT: control target
= control target key end

     0   :  { %10 = vsyncpa [#allocation3], 0  ;;  %s739_s0 = inlined_call_operand.hbm [shape: bf16[8,128], index: 0, kind: input, shape index: {}]   ;;  %s740_s1 = inlined_call_operand.hbm [shape: bf16[2,128,128], index: 1, kind: input, shape index: {}]   ;;  %s741_s2 = inlined_call_operand.hbm [shape: bf16[128,128], index: 2, kind: input, shape index: {}]   ;;  %s742_s3 = inlined_call_operand.vmem [shape: f32[2,1,128], index: 3, kind: input, shape index: {}]   ;;  %s743_s4 = inlined_call_operand.vmem [shape: f32[1,128], index: 4, kind: input, shape index: {}]   ;;  %s744_s5 = inlined_call_operand.hbm [shape: bf16[8,128], index: 5, kind: output, shape index: {}]  }
   0x1   :  { %11 = vsyncpa [#allocation6], 0 }
   0x2   :  { %12 = vsyncpa [#allocation4], 0  ;;  %s650_s18 = smov [#allocation5]  }
   0x3   :  { %s28_s19 = sshll.u32 %s650_s18, 4  ;;  %s29_s19 = int_to_ptr.vmem [resolvable:$true] %s28_s19 }
   0x4   :  { %s572_s20 = scalar_lea.vmem %s29_s19, 2048  ;;  %p577_p1 = scmp.lt.s32.totalorder %s29_s19, %s29_s19 }
   0x5   :  { %p573_p0 = scmp.ne.s32.totalorder %s29_s19, %s572_s20  ;;  %p578_p2 = scmp.lt.s32.totalorder %s572_s20, %s572_s20 }
   0x7   :  { %p579_p3 = por %p578_p2, %p577_p1 }
   0x9   :  { %p580_p4 = pnand %p579_p3, %p573_p0 }
   0xb   :  { %583 = shalt.err (!%p580_p4)
}
   0xc   :  { %s651_s21 = smov 64   ;;  %s652_s22 = smov 4  }
   0xd   :  { %34 = dma.hbm_to_vmem [thread:$0]  %s740_s1, 2048, %s29_s19, [#allocation6], %s651_s21, %s651_s21, %s652_s22  }
   0xe   :  { %s653_s25 = smov [#allocation2]   ;;  %s654_s27 = smov [#allocation7]  }
   0xf   :  { %s19_s26 = sshll.u32 %s653_s25, 4  ;;  %s40_s28 = sshll.u32 %s654_s27, 4  ;;  %s20_s26 = int_to_ptr.vmem [resolvable:$true] %s19_s26  ;;  %s41_s28 = int_to_ptr.vmem [resolvable:$true] %s40_s28 }
  0x10   :  { %s592_s29 = scalar_lea.vmem %s20_s26, 64  ;;  %p597_p6 = scmp.lt.s32.totalorder %s20_s26, %s20_s26 }
  0x11   :  { %p593_p5 = scmp.ne.s32.totalorder %s20_s26, %s592_s29  ;;  %p598_p7 = scmp.lt.s32.totalorder %s592_s29, %s592_s29 }
  0x13   :  { %p599_p8 = por %p598_p7, %p597_p6 }
  0x15   :  { %p600_p9 = pnand %p599_p8, %p593_p5 }
  0x17   :  { %603 = shalt.err (!%p600_p9)
}
  0x18   :  { %22 = dma.hbm_to_vmem [thread:$0]  %s739_s0, 64, %s20_s26, [#allocation3]  }
  0x19   :  { %s612_s7 = scalar_lea.vmem %s41_s28, 1024  ;;  %p617_p11 = scmp.lt.s32.totalorder %s41_s28, %s41_s28 }
  0x1a   :  { %p613_p10 = scmp.ne.s32.totalorder %s41_s28, %s612_s7  ;;  %p618_p12 = scmp.lt.s32.totalorder %s612_s7, %s612_s7 }
  0x1c   :  { %p619_p13 = por %p618_p12, %p617_p11 }
  0x1e   :  { %p620_p0 = pnand %p619_p13, %p613_p10 }
  0x20   :  { %623 = shalt.err (!%p620_p0)
}
  0x21   :  { %46 = dma.hbm_to_vmem [thread:$0]  %s741_s2, 1024, %s41_s28, [#allocation6], %s651_s21, %s651_s21, %s652_s22  }
  0x22   :  { %644 = dma.done.wait [#allocation3], 64  }
  0x23   :  { %645 = vsyncadd [#allocation3], 4294967232 }
  0x24   :  { %646 = dma.done.wait [#allocation6], 3072  }
  0x25   :  { %647 = vsyncadd [#allocation6], 4294964224  ;;  %v655_v0 = vmov 0.0   ;;  %vm656_vm0 = vmmov 0   ;;  %v540_v1 = vld [vmem:[#allocation5 + $0x38] sm:$0xff]   ;;  %v541_v2 = vld [vmem:[#allocation5 + $0x30] sm:$0xff]  }
  0x26   :  { %472 = vmatprep.subr.bf16.mxu0 %v655_v0  ;;  %488 = vmatprep.mubr.msk.bf16.mxu0 %vm656_vm0, %v655_v0  ;;  %v542_v3 = vld [vmem:[#allocation5 + $0x28] sm:$0xff]   ;;  %v548_v4 = vld [vmem:[#allocation5 + $0x78] sm:$0xff]   ;;  %v543_v5 = vld [vmem:[#allocation5 + $0x20] sm:$0xff]   ;;  %s657_s13 = smov [#allocation8]  }
  0x27   :  { %492 = vmatprep.subr.bf16.mxu1 %v655_v0  ;;  %508 = vmatprep.mubr.msk.bf16.mxu1 %vm656_vm0, %v655_v0  ;;  %v549_v6 = vld [vmem:[#allocation5 + $0x70] sm:$0xff]   ;;  %v544_v7 = vld [vmem:[#allocation5 + $0x18] sm:$0xff]   ;;  %v550_v8 = vld [vmem:[#allocation5 + $0x68] sm:$0xff]   ;;  %s408_s14 = sshll.u32 %s657_s13, 4  ;;  %s409_s14 = int_to_ptr.vmem [resolvable:$true] %s408_s14 }
  0x28   :  { %473 = vmatpush3.bf16.msra.mxu0 %v540_v1  ;;  %493 = vmatpush3.bf16.msra.mxu1 %v548_v4  ;;  %v545_v9 = vld [vmem:[#allocation5 + $0x10] sm:$0xff]   ;;  %v551_v10 = vld [vmem:[#allocation5 + $0x60] sm:$0xff]   ;;  %v546_v11 = vld [vmem:[#allocation5 + $0x8] sm:$0xff]   ;;  %p629_p2 = scmp.lt.s32.totalorder %s409_s14, %s409_s14 }
  0x29   :  { %474 = vmatprep.subr.bf16.mxu0 %v655_v0  ;;  %494 = vmatprep.subr.bf16.mxu1 %v655_v0  ;;  %v552_v12 = vld [vmem:[#allocation5 + $0x58] sm:$0xff]   ;;  %v547_v13 = vld [vmem:[#allocation5] sm:$0xff]   ;;  %v553_v14 = vld [vmem:[#allocation5 + $0x50] sm:$0xff]  }
  0x2a   :  { %v61_v15 = vld [vmem:[#allocation2] sm:$0xf]  ;;  %v554_v16 = vld [vmem:[#allocation5 + $0x48] sm:$0xff]   ;;  %v555_v17 = vld [vmem:[#allocation5 + $0x40] sm:$0xff]  }
  0x2b   :  { %v556_v18 = vld [vmem:[#allocation7 + $0x38] sm:$0xff]   ;;  %v557_v19 = vld [vmem:[#allocation7 + $0x30] sm:$0xff]   ;;  %v558_v20 = vld [vmem:[#allocation7 + $0x28] sm:$0xff]  }
  0x2c   :  { %475 = vmatpush3.bf16.msra.mxu0 %v541_v2  ;;  %495 = vmatpush3.bf16.msra.mxu1 %v549_v6  ;;  %v559_v21 = vld [vmem:[#allocation7 + $0x20] sm:$0xff]   ;;  %v560_v22 = vld [vmem:[#allocation7 + $0x18] sm:$0xff]   ;;  %v561_v23 = vld [vmem:[#allocation7 + $0x10] sm:$0xff]  }
  0x2d   :  { %476 = vmatprep.subr.bf16.mxu0 %v655_v0  ;;  %496 = vmatprep.subr.bf16.mxu1 %v655_v0  ;;  %v418_v24 = vld [vmem:[%s742_s3] ss:$0 sm:$0xff]  ;;  %v562_v32 = vld [vmem:[#allocation7 + $0x8] sm:$0xff]   ;;  %v563_v33 = vld [vmem:[#allocation7] sm:$0xff]  }
  0x2e   :  { %v427_v34 = vld [vmem:[%s742_s3 + $0x1] ss:$0 sm:$0xff]  ;;  %v436_v42 = vld [vmem:[%s743_s4] ss:$0 sm:$0xff]  ;;  %s624_s3 = scalar_lea.vmem %s409_s14, 64 }
  0x2f   :  { %p625_p1 = scmp.ne.s32.totalorder %s409_s14, %s624_s3  ;;  %p630_p3 = scmp.lt.s32.totalorder %s624_s3, %s624_s3 }
  0x30   :  { %477 = vmatpush3.bf16.msra.mxu0 %v542_v3  ;;  %497 = vmatpush3.bf16.msra.mxu1 %v550_v8 }
  0x31   :  { %478 = vmatprep.subr.bf16.mxu0 %v655_v0  ;;  %498 = vmatprep.subr.bf16.mxu1 %v655_v0  ;;  %p631_p4 = por %p630_p3, %p629_p2 }
  0x33   :  { %p632_p5 = pnand %p631_p4, %p625_p1 }
  0x34   :  { %479 = vmatpush3.bf16.msra.mxu0 %v543_v5  ;;  %499 = vmatpush3.bf16.msra.mxu1 %v551_v10 }
  0x35   :  { %480 = vmatprep.subr.bf16.mxu0 %v655_v0  ;;  %500 = vmatprep.subr.bf16.mxu1 %v655_v0 }
  0x38   :  { %481 = vmatpush3.bf16.msra.mxu0 %v544_v7  ;;  %501 = vmatpush3.bf16.msra.mxu1 %v552_v12 }
  0x39   :  { %482 = vmatprep.subr.bf16.mxu0 %v655_v0  ;;  %502 = vmatprep.subr.bf16.mxu1 %v655_v0 }
  0x3c   :  { %483 = vmatpush3.bf16.msra.mxu0 %v545_v9  ;;  %503 = vmatpush3.bf16.msra.mxu1 %v553_v14 }
  0x3d   :  { %484 = vmatprep.subr.bf16.mxu0 %v655_v0  ;;  %504 = vmatprep.subr.bf16.mxu1 %v655_v0 }
  0x40   :  { %485 = vmatpush3.bf16.msra.mxu0 %v546_v11  ;;  %505 = vmatpush3.bf16.msra.mxu1 %v554_v16 }
  0x41   :  { %486 = vmatprep.subr.bf16.mxu0 %v655_v0  ;;  %506 = vmatprep.subr.bf16.mxu1 %v655_v0 }
  0x44   :  { %487 = vmatpush3.bf16.msra.mxu0 %v547_v13  ;;  %507 = vmatpush3.bf16.msra.mxu1 %v555_v17 }
  0x45   :  { %512 = vmatprep.subr.bf16.mxu0 %v655_v0 }
  0x47   :  { %489 = vmatmul.mubr.bf16.vlgmr.msra.gmra.mxu0 %v61_v15 }
  0x48   :  { %528 = vmatprep.mubr.msk.bf16.mxu0 %vm656_vm0, %v655_v0  ;;  %513 = vmatpush3.bf16.msra.mxu0 %v556_v18 }
  0x49   :  { %514 = vmatprep.subr.bf16.mxu0 %v655_v0 }
  0x4c   :  { %515 = vmatpush3.bf16.msra.mxu0 %v557_v19 }
  0x4d   :  { %516 = vmatprep.subr.bf16.mxu0 %v655_v0 }
  0x50   :  { %517 = vmatpush3.bf16.msra.mxu0 %v558_v20 }
  0x51   :  { %518 = vmatprep.subr.bf16.mxu0 %v655_v0 }
  0x54   :  { %519 = vmatpush3.bf16.msra.mxu0 %v559_v21 }
  0x55   :  { %520 = vmatprep.subr.bf16.mxu0 %v655_v0 }
  0x58   :  { %521 = vmatpush3.bf16.msra.mxu0 %v560_v22 }
  0x59   :  { %522 = vmatprep.subr.bf16.mxu0 %v655_v0 }
  0x5c   :  { %523 = vmatpush3.bf16.msra.mxu0 %v561_v23 }
  0x5d   :  { %524 = vmatprep.subr.bf16.mxu0 %v655_v0 }
  0x60   :  { %525 = vmatpush3.bf16.msra.mxu0 %v562_v32 }
  0x61   :  { %526 = vmatprep.subr.bf16.mxu0 %v655_v0 }
  0x64   :  { %527 = vmatpush3.bf16.msra.mxu0 %v563_v33 }
 0x107   :  { %v168_v25 = vpop.f32.mrf.mxu0 }
 0x108   :  { %v169_v26 = vadd.f32 %v418_v24, %v168_v25 }
 0x109   :  { %v490_v27 = vpop.f32.mrf.mxu0 }
 0x10a   :  { %v174_v28 = vmax.f32 %v169_v26, 0.0 }
 0x10b   :  { %v171_v29 = vpop.f32.mrf.mxu0 }
 0x10c   :  { %v175_v30 = vpack.c.bf16 %v174_v28, %v174_v28 }
 0x10d   :  { %v491_v31 = vpop.f32.mrf.mxu0 }
 0x10e   :  { %509 = vmatmul.mubr.bf16.vlgmr.msra.gmra.mxu1 %v175_v30 }
 0x1ce   :  { %v281_v35 = vpop.f32.mrf.mxu1 }
 0x1cf   :  { %v282_v36 = vadd.f32 %v427_v34, %v281_v35 }
 0x1d0   :  { %v510_v37 = vpop.f32.mrf.mxu1 }
 0x1d1   :  { %v287_v38 = vmax.f32 %v282_v36, 0.0 }
 0x1d2   :  { %v284_v39 = vpop.f32.mrf.mxu1 }
 0x1d3   :  { %v288_v40 = vpack.c.bf16 %v287_v38, %v287_v38 }
 0x1d4   :  { %v511_v41 = vpop.f32.mrf.mxu1 }
 0x1d5   :  { %529 = vmatmul.mubr.bf16.vlgmr.msra.gmra.mxu0 %v288_v40 }
 0x295   :  { %v394_v43 = vpop.f32.mrf.mxu0 }
 0x296   :  { %v395_v44 = vadd.f32 %v436_v42, %v394_v43 }
 0x297   :  { %v530_v45 = vpop.f32.mrf.mxu0 }
 0x298   :  { %v400_v46 = vpack.c.bf16 %v395_v44, %v395_v44 }
 0x299   :  { %v397_v47 = vpop.f32.mrf.mxu0 }
 0x29a   :  { %401 = vst [vmem:[#allocation8] sm:$0xf] %v400_v46 }
 0x29b   :  { %v531_v48 = vpop.f32.mrf.mxu0 }
 0x29c   :  { %635 = shalt.err (!%p632_p5)
}
 0x29d   :  { %411 = dma.vmem_to_hbm [thread:$0]  %s409_s14, 64, %s744_s5, [#allocation4]  }
 0x29e   :  { %648 = dma.done.wait [#allocation4], 64  }
 0x29f   :  { %649 = vsyncadd [#allocation4], 4294967232 }
 0x2a0   :  { %415 = vsyncpa [#allocation3], 1 }
 0x2a1   :  { %416 = vsyncpa [#allocation6], 1 }
 0x2a2   :  { %417 = vsyncpa [#allocation4], 1 }

// kernel: tpu_custom_call.1
= control target key start
LH: loop header
LB: loop body
LE: loop exit
PB: predicated region body
PF: predicated region fallthrough
CT: control target
= control target key end

     0   :  { %10 = vsyncpa [#allocation3], 0  ;;  %s739_s0 = inlined_call_operand.hbm [shape: bf16[8,128], index: 0, kind: input, shape index: {}]   ;;  %s740_s1 = inlined_call_operand.hbm [shape: bf16[2,128,128], index: 1, kind: input, shape index: {}]   ;;  %s741_s2 = inlined_call_operand.hbm [shape: bf16[128,128], index: 2, kind: input, shape index: {}]   ;;  %s742_s3 = inlined_call_operand.vmem [shape: f32[2,1,128], index: 3, kind: input, shape index: {}]   ;;  %s743_s4 = inlined_call_operand.vmem [shape: f32[1,128], index: 4, kind: input, shape index: {}]   ;;  %s744_s5 = inlined_call_operand.hbm [shape: bf16[8,128], index: 5, kind: output, shape index: {}]  }
   0x1   :  { %11 = vsyncpa [#allocation6], 0 }
   0x2   :  { %12 = vsyncpa [#allocation4], 0  ;;  %s650_s18 = smov [#allocation5]  }
   0x3   :  { %s28_s19 = sshll.u32 %s650_s18, 4  ;;  %s29_s19 = int_to_ptr.vmem [resolvable:$true] %s28_s19 }
   0x4   :  { %s572_s20 = scalar_lea.vmem %s29_s19, 2048  ;;  %p577_p1 = scmp.lt.s32.totalorder %s29_s19, %s29_s19 }
   0x5   :  { %p573_p0 = scmp.ne.s32.totalorder %s29_s19, %s572_s20  ;;  %p578_p2 = scmp.lt.s32.totalorder %s572_s20, %s572_s20 }
   0x7   :  { %p579_p3 = por %p578_p2, %p577_p1 }
   0x9   :  { %p580_p4 = pnand %p579_p3, %p573_p0 }
   0xb   :  { %583 = shalt.err (!%p580_p4)
}
   0xc   :  { %s651_s21 = smov 64   ;;  %s652_s22 = smov 4  }
   0xd   :  { %34 = dma.hbm_to_vmem [thread:$0]  %s740_s1, 2048, %s29_s19, [#allocation6], %s651_s21, %s651_s21, %s652_s22  }
   0xe   :  { %s653_s25 = smov [#allocation2]   ;;  %s654_s27 = smov [#allocation7]  }
   0xf   :  { %s19_s26 = sshll.u32 %s653_s25, 4  ;;  %s40_s28 = sshll.u32 %s654_s27, 4  ;;  %s20_s26 = int_to_ptr.vmem [resolvable:$true] %s19_s26  ;;  %s41_s28 = int_to_ptr.vmem [resolvable:$true] %s40_s28 }
  0x10   :  { %s592_s29 = scalar_lea.vmem %s20_s26, 64  ;;  %p597_p6 = scmp.lt.s32.totalorder %s20_s26, %s20_s26 }
  0x11   :  { %p593_p5 = scmp.ne.s32.totalorder %s20_s26, %s592_s29  ;;  %p598_p7 = scmp.lt.s32.totalorder %s592_s29, %s592_s29 }
  0x13   :  { %p599_p8 = por %p598_p7, %p597_p6 }
  0x15   :  { %p600_p9 = pnand %p599_p8, %p593_p5 }
  0x17   :  { %603 = shalt.err (!%p600_p9)
}
  0x18   :  { %22 = dma.hbm_to_vmem [thread:$0]  %s739_s0, 64, %s20_s26, [#allocation3]  }
  0x19   :  { %s612_s7 = scalar_lea.vmem %s41_s28, 1024  ;;  %p617_p11 = scmp.lt.s32.totalorder %s41_s28, %s41_s28 }
  0x1a   :  { %p613_p10 = scmp.ne.s32.totalorder %s41_s28, %s612_s7  ;;  %p618_p12 = scmp.lt.s32.totalorder %s612_s7, %s612_s7 }
  0x1c   :  { %p619_p13 = por %p618_p12, %p617_p11 }
  0x1e   :  { %p620_p0 = pnand %p619_p13, %p613_p10 }
  0x20   :  { %623 = shalt.err (!%p620_p0)
}
  0x21   :  { %46 = dma.hbm_to_vmem [thread:$0]  %s741_s2, 1024, %s41_s28, [#allocation6], %s651_s21, %s651_s21, %s652_s22  }
  0x22   :  { %644 = dma.done.wait [#allocation3], 64  }
  0x23   :  { %645 = vsyncadd [#allocation3], 4294967232 }
  0x24   :  { %646 = dma.done.wait [#allocation6], 3072  }
  0x25   :  { %647 = vsyncadd [#allocation6], 4294964224  ;;  %v655_v0 = vmov 0.0   ;;  %vm656_vm0 = vmmov 0   ;;  %v540_v1 = vld [vmem:[#allocation5 + $0x38] sm:$0xff]   ;;  %v541_v2 = vld [vmem:[#allocation5 + $0x30] sm:$0xff]  }
  0x26   :  { %472 = vmatprep.subr.bf16.mxu0 %v655_v0  ;;  %488 = vmatprep.mubr.msk.bf16.mxu0 %vm656_vm0, %v655_v0  ;;  %v542_v3 = vld [vmem:[#allocation5 + $0x28] sm:$0xff]   ;;  %v548_v4 = vld [vmem:[#allocation5 + $0x78] sm:$0xff]   ;;  %v543_v5 = vld [vmem:[#allocation5 + $0x20] sm:$0xff]   ;;  %s657_s13 = smov [#allocation8]  }
  0x27   :  { %492 = vmatprep.subr.bf16.mxu1 %v655_v0  ;;  %508 = vmatprep.mubr.msk.bf16.mxu1 %vm656_vm0, %v655_v0  ;;  %v549_v6 = vld [vmem:[#allocation5 + $0x70] sm:$0xff]   ;;  %v544_v7 = vld [vmem:[#allocation5 + $0x18] sm:$0xff]   ;;  %v550_v8 = vld [vmem:[#allocation5 + $0x68] sm:$0xff]   ;;  %s408_s14 = sshll.u32 %s657_s13, 4  ;;  %s409_s14 = int_to_ptr.vmem [resolvable:$true] %s408_s14 }
  0x28   :  { %473 = vmatpush3.bf16.msra.mxu0 %v540_v1  ;;  %493 = vmatpush3.bf16.msra.mxu1 %v548_v4  ;;  %v545_v9 = vld [vmem:[#allocation5 + $0x10] sm:$0xff]   ;;  %v551_v10 = vld [vmem:[#allocation5 + $0x60] sm:$0xff]   ;;  %v546_v11 = vld [vmem:[#allocation5 + $0x8] sm:$0xff]   ;;  %p629_p2 = scmp.lt.s32.totalorder %s409_s14, %s409_s14 }
  0x29   :  { %474 = vmatprep.subr.bf16.mxu0 %v655_v0  ;;  %494 = vmatprep.subr.bf16.mxu1 %v655_v0  ;;  %v552_v12 = vld [vmem:[#allocation5 + $0x58] sm:$0xff]   ;;  %v547_v13 = vld [vmem:[#allocation5] sm:$0xff]   ;;  %v553_v14 = vld [vmem:[#allocation5 + $0x50] sm:$0xff]  }
  0x2a   :  { %v61_v15 = vld [vmem:[#allocation2] sm:$0xf]  ;;  %v554_v16 = vld [vmem:[#allocation5 + $0x48] sm:$0xff]   ;;  %v555_v17 = vld [vmem:[#allocation5 + $0x40] sm:$0xff]  }
  0x2b   :  { %v556_v18 = vld [vmem:[#allocation7 + $0x38] sm:$0xff]   ;;  %v557_v19 = vld [vmem:[#allocation7 + $0x30] sm:$0xff]   ;;  %v558_v20 = vld [vmem:[#allocation7 + $0x28] sm:$0xff]  }
  0x2c   :  { %475 = vmatpush3.bf16.msra.mxu0 %v541_v2  ;;  %495 = vmatpush3.bf16.msra.mxu1 %v549_v6  ;;  %v559_v21 = vld [vmem:[#allocation7 + $0x20] sm:$0xff]   ;;  %v560_v22 = vld [vmem:[#allocation7 + $0x18] sm:$0xff]   ;;  %v561_v23 = vld [vmem:[#allocation7 + $0x10] sm:$0xff]  }
  0x2d   :  { %476 = vmatprep.subr.bf16.mxu0 %v655_v0  ;;  %496 = vmatprep.subr.bf16.mxu1 %v655_v0  ;;  %v418_v24 = vld [vmem:[%s742_s3] ss:$0 sm:$0xff]  ;;  %v562_v32 = vld [vmem:[#allocation7 + $0x8] sm:$0xff]   ;;  %v563_v33 = vld [vmem:[#allocation7] sm:$0xff]  }
  0x2e   :  { %v427_v34 = vld [vmem:[%s742_s3 + $0x1] ss:$0 sm:$0xff]  ;;  %v436_v42 = vld [vmem:[%s743_s4] ss:$0 sm:$0xff]  ;;  %s624_s3 = scalar_lea.vmem %s409_s14, 64 }
  0x2f   :  { %p625_p1 = scmp.ne.s32.totalorder %s409_s14, %s624_s3  ;;  %p630_p3 = scmp.lt.s32.totalorder %s624_s3, %s624_s3 }
  0x30   :  { %477 = vmatpush3.bf16.msra.mxu0 %v542_v3  ;;  %497 = vmatpush3.bf16.msra.mxu1 %v550_v8 }
  0x31   :  { %478 = vmatprep.subr.bf16.mxu0 %v655_v0  ;;  %498 = vmatprep.subr.bf16.mxu1 %v655_v0  ;;  %p631_p4 = por %p630_p3, %p629_p2 }
  0x33   :  { %p632_p5 = pnand %p631_p4, %p625_p1 }
  0x34   :  { %479 = vmatpush3.bf16.msra.mxu0 %v543_v5  ;;  %499 = vmatpush3.bf16.msra.mxu1 %v551_v10 }
  0x35   :  { %480 = vmatprep.subr.bf16.mxu0 %v655_v0  ;;  %500 = vmatprep.subr.bf16.mxu1 %v655_v0 }
  0x38   :  { %481 = vmatpush3.bf16.msra.mxu0 %v544_v7  ;;  %501 = vmatpush3.bf16.msra.mxu1 %v552_v12 }
  0x39   :  { %482 = vmatprep.subr.bf16.mxu0 %v655_v0  ;;  %502 = vmatprep.subr.bf16.mxu1 %v655_v0 }
  0x3c   :  { %483 = vmatpush3.bf16.msra.mxu0 %v545_v9  ;;  %503 = vmatpush3.bf16.msra.mxu1 %v553_v14 }
  0x3d   :  { %484 = vmatprep.subr.bf16.mxu0 %v655_v0  ;;  %504 = vmatprep.subr.bf16.mxu1 %v655_v0 }
  0x40   :  { %485 = vmatpush3.bf16.msra.mxu0 %v546_v11  ;;  %505 = vmatpush3.bf16.msra.mxu1 %v554_v16 }
  0x41   :  { %486 = vmatprep.subr.bf16.mxu0 %v655_v0  ;;  %506 = vmatprep.subr.bf16.mxu1 %v655_v0 }
  0x44   :  { %487 = vmatpush3.bf16.msra.mxu0 %v547_v13  ;;  %507 = vmatpush3.bf16.msra.mxu1 %v555_v17 }
  0x45   :  { %512 = vmatprep.subr.bf16.mxu0 %v655_v0 }
  0x47   :  { %489 = vmatmul.mubr.bf16.vlgmr.msra.gmra.mxu0 %v61_v15 }
  0x48   :  { %528 = vmatprep.mubr.msk.bf16.mxu0 %vm656_vm0, %v655_v0  ;;  %513 = vmatpush3.bf16.msra.mxu0 %v556_v18 }
  0x49   :  { %514 = vmatprep.subr.bf16.mxu0 %v655_v0 }
  0x4c   :  { %515 = vmatpush3.bf16.msra.mxu0 %v557_v19 }
  0x4d   :  { %516 = vmatprep.subr.bf16.mxu0 %v655_v0 }
  0x50   :  { %517 = vmatpush3.bf16.msra.mxu0 %v558_v20 }
  0x51   :  { %518 = vmatprep.subr.bf16.mxu0 %v655_v0 }
  0x54   :  { %519 = vmatpush3.bf16.msra.mxu0 %v559_v21 }
  0x55   :  { %520 = vmatprep.subr.bf16.mxu0 %v655_v0 }
  0x58   :  { %521 = vmatpush3.bf16.msra.mxu0 %v560_v22 }
  0x59   :  { %522 = vmatprep.subr.bf16.mxu0 %v655_v0 }
  0x5c   :  { %523 = vmatpush3.bf16.msra.mxu0 %v561_v23 }
  0x5d   :  { %524 = vmatprep.subr.bf16.mxu0 %v655_v0 }
  0x60   :  { %525 = vmatpush3.bf16.msra.mxu0 %v562_v32 }
  0x61   :  { %526 = vmatprep.subr.bf16.mxu0 %v655_v0 }
  0x64   :  { %527 = vmatpush3.bf16.msra.mxu0 %v563_v33 }
 0x107   :  { %v168_v25 = vpop.f32.mrf.mxu0 }
 0x108   :  { %v169_v26 = vadd.f32 %v418_v24, %v168_v25 }
 0x109   :  { %v490_v27 = vpop.f32.mrf.mxu0 }
 0x10a   :  { %v174_v28 = vmax.f32 %v169_v26, 0.0 }
 0x10b   :  { %v171_v29 = vpop.f32.mrf.mxu0 }
 0x10c   :  { %v175_v30 = vpack.c.bf16 %v174_v28, %v174_v28 }
 0x10d   :  { %v491_v31 = vpop.f32.mrf.mxu0 }
 0x10e   :  { %509 = vmatmul.mubr.bf16.vlgmr.msra.gmra.mxu1 %v175_v30 }
 0x1ce   :  { %v281_v35 = vpop.f32.mrf.mxu1 }
 0x1cf   :  { %v282_v36 = vadd.f32 %v427_v34, %v281_v35 }
 0x1d0   :  { %v510_v37 = vpop.f32.mrf.mxu1 }
 0x1d1   :  { %v287_v38 = vmax.f32 %v282_v36, 0.0 }
 0x1d2   :  { %v284_v39 = vpop.f32.mrf.mxu1 }
 0x1d3   :  { %v288_v40 = vpack.c.bf16 %v287_v38, %v287_v38 }
 0x1d4   :  { %v511_v41 = vpop.f32.mrf.mxu1 }
 0x1d5   :  { %529 = vmatmul.mubr.bf16.vlgmr.msra.gmra.mxu0 %v288_v40 }
 0x295   :  { %v394_v43 = vpop.f32.mrf.mxu0 }
 0x296   :  { %v395_v44 = vadd.f32 %v436_v42, %v394_v43 }
 0x297   :  { %v530_v45 = vpop.f32.mrf.mxu0 }
 0x298   :  { %v400_v46 = vpack.c.bf16 %v395_v44, %v395_v44 }
 0x299   :  { %v397_v47 = vpop.f32.mrf.mxu0 }
 0x29a   :  { %401 = vst [vmem:[#allocation8] sm:$0xf] %v400_v46 }
 0x29b   :  { %v531_v48 = vpop.f32.mrf.mxu0 }
 0x29c   :  { %635 = shalt.err (!%p632_p5)
}
 0x29d   :  { %411 = dma.vmem_to_hbm [thread:$0]  %s409_s14, 64, %s744_s5, [#allocation4]  }
 0x29e   :  { %648 = dma.done.wait [#allocation4], 64  }
 0x29f   :  { %649 = vsyncadd [#allocation4], 4294967232 }
 0x2a0   :  { %415 = vsyncpa [#allocation3], 1 }
 0x2a1   :  { %416 = vsyncpa [#allocation6], 1 }
 0x2a2   :  { %417 = vsyncpa [#allocation4], 1 }

</bundles_post_ra>
